<compile_context>
chip_gen: v5e
topology: v5e:2x2
jax: 0.10.0
libtpu: 0.0.40
codegen_flags: <defaults>
</compile_context>

<pallas_src>
import functools

import jax
import jax.numpy as jnp
from jax.experimental import pallas as pl
from jax.experimental.pallas import tpu as pltpu


def _round_up(x: int, m: int) -> int:
    return ((x + m - 1) // m) * m


# --------------------- fused small-graph kernel (adj resident) ---------------

def _sgc_fused_kernel(x_ref, adj_ref, wt_ref, b_ref, o_ref, *, K, mxu_dtype):
    # h0 = x @ W^T  (f32 accumulation on the MXU).
    h = jnp.dot(x_ref[...], wt_ref[...], preferred_element_type=jnp.float32)
    # K hops: h <- adj @ h.  MXU operands in mxu_dtype, f32 accumulation.
    for _ in range(K):
        h = jnp.dot(adj_ref[...], h.astype(mxu_dtype),
                    preferred_element_type=jnp.float32)
    o_ref[...] = (h + b_ref[...]).astype(o_ref.dtype)


# --------------------------- tiled-path kernels -------------------------------

def _linear_kernel(x_ref, wt_ref, b_ref, o_ref, *, add_bias):
    # h0 tile = x_tile @ W^T (lane-dense, F-padded); bias only if K == 0.
    z = jnp.dot(x_ref[...], wt_ref[...], preferred_element_type=jnp.float32)
    if add_bias:
        z = z + b_ref[...]
    o_ref[...] = z.astype(o_ref.dtype)


def _prop_kernel_inplace(adj_ref, h_ref, b_ref, o_ref, *, tk, add_bias, resident_h):
    # One hop of h <- adj @ h, accumulating directly into the resident f32
    # output block (no scratch).  Output block index is (i, 0): constant
    # across the reduction axis k.
    k = pl.program_id(1)

    @pl.when(k == 0)
    def _():
        o_ref[...] = jnp.zeros_like(o_ref)

    if resident_h:
        off = pl.multiple_of(k * tk, tk)
        h_blk = h_ref[pl.ds(off, tk), :]
    else:
        h_blk = h_ref[...]
    o_ref[...] += jnp.dot(adj_ref[...], h_blk, preferred_element_type=jnp.float32)

    if add_bias:
        @pl.when(k == pl.num_programs(1) - 1)
        def _():
            o_ref[...] += b_ref[...]


def _prop_kernel_acc(adj_ref, h_ref, b_ref, o_ref, acc_ref, *, tk, add_bias,
                     resident_h):
    # Same hop, but with an f32 VMEM accumulator (used when the hop output
    # dtype is narrower than f32, e.g. bf16 intermediate hops).
    k = pl.program_id(1)

    @pl.when(k == 0)
    def _():
        acc_ref[...] = jnp.zeros_like(acc_ref)

    if resident_h:
        off = pl.multiple_of(k * tk, tk)
        h_blk = h_ref[pl.ds(off, tk), :]
    else:
        h_blk = h_ref[...]
    acc_ref[...] += jnp.dot(adj_ref[...], h_blk, preferred_element_type=jnp.float32)

    @pl.when(k == pl.num_programs(1) - 1)
    def _():
        out = acc_ref[...]
        if add_bias:
            out = out + b_ref[...]
        o_ref[...] = out.astype(o_ref.dtype)


# --------------------------------- wrapper ------------------------------------

def sgc_forward(x, adj, weight, bias, K: int = 2, *,
                mxu_dtype=jnp.bfloat16, force_tiled: bool = False):
    """
    x      : (N, in_features)
    adj    : (N, N) dense adjacency
    weight : (out_features, in_features)   -- nn.Linear weight
    bias   : (out_features,)               -- nn.Linear bias
    mxu_dtype : dtype for the adjacency / propagated-h MXU operands
                (bf16 halves the dominant HBM traffic; f32 is exact).
    """
    N, f_in = x.shape
    f_out = weight.shape[0]
    out_dtype = x.dtype
    mxu_dtype = jnp.dtype(mxu_dtype)
    mxu_bytes = mxu_dtype.itemsize

    # Lane-dense padded feature width (multiple of 128; do NOT pad further —
    # the adjacency HBM stream, not MXU width, is the binding resource).
    F = _round_up(max(f_out, 1), 128)
    wt = jnp.pad(weight.T, ((0, 0), (0, F - f_out))).astype(jnp.float32)  # (f_in, F)
    b2 = jnp.pad(bias, (0, F - f_out)).reshape(1, F).astype(jnp.float32)  # (1, F)

    VMEM_48M = 48 * 1024 * 1024

    # ---- Small-graph fast path: adj resident in VMEM, single fused call ----
    fused_bytes = (N * N * mxu_bytes                    # adj (resident)
                   + N * f_in * jnp.dtype(x.dtype).itemsize
                   + f_in * F * 4 + F * 4               # W^T, bias
                   + 4 * N * F * 4)                     # output + h temporaries
    if not force_tiled and fused_bytes <= 16 * 1024 * 1024:
        adj_m = adj.astype(mxu_dtype)
        out = pl.pallas_call(
            functools.partial(_sgc_fused_kernel, K=K, mxu_dtype=mxu_dtype),
            out_shape=jax.ShapeDtypeStruct((N, F), out_dtype),
            grid_spec=pltpu.PrefetchScalarGridSpec(
                num_scalar_prefetch=0,
                grid=(1,),
                in_specs=[
                    pl.BlockSpec((N, f_in), lambda i: (0, 0)),   # x
                    pl.BlockSpec((N, N), lambda i: (0, 0)),      # adj
                    pl.BlockSpec((f_in, F), lambda i: (0, 0)),   # W^T
                    pl.BlockSpec((1, F), lambda i: (0, 0)),      # bias
                ],
                out_specs=pl.BlockSpec((N, F), lambda i: (0, 0)),
            ),
            compiler_params=pltpu.CompilerParams(
                dimension_semantics=("arbitrary",),
                vmem_limit_bytes=VMEM_48M,
            ),
        )(x, adj_m, wt, b2)
        return out[:, :f_out]

    # ---- Tiled path: pad N (no full-extent fallback tiles) ------------------
    N_pad = _round_up(N, 256)
    x_p = jnp.pad(x, ((0, N_pad - N), (0, 0)))
    adj_p = jnp.pad(adj, ((0, N_pad - N), (0, N_pad - N))).astype(mxu_dtype)

    # Row tile / reduction tile (both divide N_pad).
    tm = 512 if N_pad % 512 == 0 else 256
    tk_candidates = [t for t in (2048, 1024, 512, 256) if N_pad % t == 0]

    # Keep h fully resident (one HBM read per hop) if it fits a conservative
    # budget (counted x2 for pipeline buffering); otherwise stream (tk, F).
    h_bytes = N_pad * F * mxu_bytes
    resident_h = 2 * h_bytes <= 12 * 1024 * 1024

    # Largest tk whose total working set stays under ~36 MiB (safe on v7x).
    budget = 36 * 1024 * 1024
    tk = tk_candidates[-1]
    for cand in tk_candidates:
        need = (2 * tm * cand * mxu_bytes                                  # adj x2
                + (2 * h_bytes if resident_h else 2 * cand * F * mxu_bytes)
                + 2 * tm * F * 4                                           # out x2
                + tm * F * 4                                               # acc
                + 2 * F * 4)                                               # bias
        if need <= budget:
            tk = cand
            break

    # ---- Step 1: linear first (narrow propagation): h0 = x @ W^T -----------
    tm_lin = 256
    h = pl.pallas_call(
        functools.partial(_linear_kernel, add_bias=(K == 0)),
        out_shape=jax.ShapeDtypeStruct((N_pad, F),
                                       mxu_dtype if K > 0 else out_dtype),
        grid_spec=pltpu.PrefetchScalarGridSpec(
            num_scalar_prefetch=0,
            grid=(N_pad // tm_lin,),
            in_specs=[
                pl.BlockSpec((tm_lin, f_in), lambda i: (i, 0)),   # x row tile
                pl.BlockSpec((f_in, F), lambda i: (0, 0)),        # W^T (resident)
                pl.BlockSpec((1, F), lambda i: (0, 0)),           # bias (resident)
            ],
            out_specs=pl.BlockSpec((tm_lin, F), lambda i: (i, 0)),
        ),
        compiler_params=pltpu.CompilerParams(
            dimension_semantics=("parallel",),
            vmem_limit_bytes=VMEM_48M,
        ),
    )(x_p, wt, b2)

    # ---- Step 2: K hops of propagation (tiled adj stream) -------------------
    grid = (N_pad // tm, N_pad // tk)
    adj_spec = pl.BlockSpec((tm, tk), lambda i, k: (i, k))
    if resident_h:
        h_spec = pl.BlockSpec((N_pad, F), lambda i, k: (0, 0))    # loaded once/hop
    else:
        h_spec = pl.BlockSpec((tk, F), lambda i, k: (k, 0))
    b_spec = pl.BlockSpec((1, F), lambda i, k: (0, 0))
    out_spec = pl.BlockSpec((tm, F), lambda i, k: (i, 0))

    for hop in range(K):
        last = hop == K - 1
        hop_dtype = out_dtype if last else mxu_dtype
        if jnp.dtype(hop_dtype) == jnp.float32:
            kern = functools.partial(_prop_kernel_inplace, tk=tk,
                                     add_bias=last, resident_h=resident_h)
            scratch = []
        else:
            kern = functools.partial(_prop_kernel_acc, tk=tk,
                                     add_bias=last, resident_h=resident_h)
            scratch = [pltpu.VMEM((tm, F), jnp.float32)]
        h = pl.pallas_call(
            kern,
            out_shape=jax.ShapeDtypeStruct((N_pad, F), hop_dtype),
            grid_spec=pltpu.PrefetchScalarGridSpec(
                num_scalar_prefetch=0,
                grid=grid,
                in_specs=[adj_spec, h_spec, b_spec],
                out_specs=out_spec,
                scratch_shapes=scratch,
            ),
            compiler_params=pltpu.CompilerParams(
                dimension_semantics=("parallel", "arbitrary"),
                vmem_limit_bytes=VMEM_48M,
            ),
        )(adj_p, h, b2)

    # Slice the real rows / classes out of the padded result.
    return h[:N, :f_out]


if __name__ == "__main__":
    # Small, SGC-consistent shapes: N nodes, in_features, out_features (classes).
    N, in_features, out_features, K = 64, 32, 16, 2

    key = jax.random.PRNGKey(0)
    kx, kadj, kw, kb = jax.random.split(key, 4)

    x = jax.random.normal(kx, (N, in_features), dtype=jnp.float32)

    # Synthetic symmetric row-normalized adjacency with self loops.
    a = (jax.random.uniform(kadj, (N, N)) < 0.1).astype(jnp.float32)
    a = jnp.maximum(a, a.T) + jnp.eye(N, dtype=jnp.float32)
    a = a / jnp.sum(a, axis=1, keepdims=True)

    # Deterministic nn.Linear-style params (uniform in [-1/sqrt(fan_in), 1/sqrt(fan_in)]).
    bound = 1.0 / jnp.sqrt(jnp.float32(in_features))
    weight = jax.random.uniform(kw, (out_features, in_features), dtype=jnp.float32,
                                minval=-bound, maxval=bound)
    bias = jax.random.uniform(kb, (out_features,), dtype=jnp.float32,
                              minval=-bound, maxval=bound)

    # Pure-JAX reference (original op order: propagate, then linear).
    h_ref = x
    for _ in range(K):
        h_ref = a @ h_ref
    ref = h_ref @ weight.T + bias

    # 1) exact f32, fused small-graph path.
    out_f32 = jax.block_until_ready(
        sgc_forward(x, a, weight, bias, K=K, mxu_dtype=jnp.float32))
    # 2) default bf16-MXU operands, fused small-graph path.
    out_bf16 = jax.block_until_ready(sgc_forward(x, a, weight, bias, K=K))
    # 3) large-graph tiled pipeline forced at small size, exact f32.
    out_tiled_f32 = jax.block_until_ready(
        sgc_forward(x, a, weight, bias, K=K, mxu_dtype=jnp.float32,
                    force_tiled=True))
    # 4) large-graph tiled pipeline with bf16 adjacency / h.
    out_tiled_bf16 = jax.block_until_ready(
        sgc_forward(x, a, weight, bias, K=K, force_tiled=True))

    assert out_f32.shape == (N, out_features)
    assert jnp.allclose(out_f32, ref, atol=1e-4, rtol=1e-4), "f32 fused mismatch"
    assert jnp.allclose(out_tiled_f32, ref, atol=1e-4, rtol=1e-4), "f32 tiled mismatch"
    assert jnp.allclose(out_bf16, ref, atol=3e-2, rtol=3e-2), "bf16 fused mismatch"
    assert jnp.allclose(out_tiled_bf16, ref, atol=3e-2, rtol=3e-2), "bf16 tiled mismatch"

    print("KERNEL_OK")
</pallas_src>

<mosaic_0001>
module attributes {stable_mosaic.version = 11 : i64} {
  func.func @_sgc_fused_kernel(%arg0: i32, %arg1: memref<64x32xf32, #tpu.memory_space<vmem>>, %arg2: memref<64x64xf32, #tpu.memory_space<vmem>>, %arg3: memref<32x128xf32, #tpu.memory_space<vmem>>, %arg4: memref<1x128xf32, #tpu.memory_space<vmem>>, %arg5: memref<64x128xf32, #tpu.memory_space<vmem>>) attributes {dimension_semantics = [#tpu.dimension_semantics<arbitrary>], iteration_bounds = array<i64: 1>, scalar_prefetch = 0 : i64, scratch_operands = 0 : i64, tpu.core_type = #tpu.core_type<tc>, window_params = [{pipeline_mode = #tpu.pipeline_mode<synchronous>, transform_indices = @transform_0, window_bounds = array<i64: 64, 32>}, {pipeline_mode = #tpu.pipeline_mode<synchronous>, transform_indices = @transform_1, window_bounds = array<i64: 64, 64>}, {pipeline_mode = #tpu.pipeline_mode<synchronous>, transform_indices = @transform_2, window_bounds = array<i64: 32, 128>}, {pipeline_mode = #tpu.pipeline_mode<synchronous>, transform_indices = @transform_3, window_bounds = array<i64: 1, 128>}, {pipeline_mode = #tpu.pipeline_mode<synchronous>, transform_indices = @transform_4, window_bounds = array<i64: 64, 128>}]} {
    %c0 = arith.constant 0 : index
    %c0_0 = arith.constant 0 : index
    %0 = vector.load %arg1[%c0, %c0_0] : memref<64x32xf32, #tpu.memory_space<vmem>>, vector<64x32xf32>
    %c0_1 = arith.constant 0 : index
    %c0_2 = arith.constant 0 : index
    %1 = vector.load %arg3[%c0_1, %c0_2] : memref<32x128xf32, #tpu.memory_space<vmem>>, vector<32x128xf32>
    %cst = arith.constant dense<0.000000e+00> : vector<64x128xf32>
    %2 = tpu.matmul %0, %1, %cst {dimension_numbers = #tpu.dot_dimension_numbers<[1], [0], [0], [1], [0, 0, 1, 1], [], []>} : vector<64x32xf32>, vector<32x128xf32>, vector<64x128xf32> -> vector<64x128xf32>
    %c0_3 = arith.constant 0 : index
    %c0_4 = arith.constant 0 : index
    %3 = vector.load %arg2[%c0_3, %c0_4] : memref<64x64xf32, #tpu.memory_space<vmem>>, vector<64x64xf32>
    %cst_5 = arith.constant dense<0.000000e+00> : vector<64x128xf32>
    %4 = tpu.matmul %3, %2, %cst_5 {dimension_numbers = #tpu.dot_dimension_numbers<[1], [0], [0], [1], [0, 0, 1, 1], [], []>} : vector<64x64xf32>, vector<64x128xf32>, vector<64x128xf32> -> vector<64x128xf32>
    %c0_6 = arith.constant 0 : index
    %c0_7 = arith.constant 0 : index
    %5 = vector.load %arg2[%c0_6, %c0_7] : memref<64x64xf32, #tpu.memory_space<vmem>>, vector<64x64xf32>
    %cst_8 = arith.constant dense<0.000000e+00> : vector<64x128xf32>
    %6 = tpu.matmul %5, %4, %cst_8 {dimension_numbers = #tpu.dot_dimension_numbers<[1], [0], [0], [1], [0, 0, 1, 1], [], []>} : vector<64x64xf32>, vector<64x128xf32>, vector<64x128xf32> -> vector<64x128xf32>
    %c0_9 = arith.constant 0 : index
    %c0_10 = arith.constant 0 : index
    %7 = vector.load %arg4[%c0_9, %c0_10] : memref<1x128xf32, #tpu.memory_space<vmem>>, vector<1x128xf32>
    %8 = vector.broadcast %7 : vector<1x128xf32> to vector<64x128xf32>
    %9 = arith.addf %6, %8 : vector<64x128xf32>
    %c0_11 = arith.constant 0 : index
    %c0_12 = arith.constant 0 : index
    %10 = vector.load %arg5[%c0_11, %c0_12] : memref<64x128xf32, #tpu.memory_space<vmem>>, vector<64x128xf32>
    tpu.vector_store %arg5[%c0_11, %c0_12], %9 {strides = array<i32>} : memref<64x128xf32, #tpu.memory_space<vmem>>, vector<64x128xf32>,
    return
  }
  func.func @transform_0(%arg0: i32) -> (i32, i32) {
    %c0_i32 = arith.constant 0 : i32
    %c0_i32_0 = arith.constant 0 : i32
    %c0_i32_1 = arith.constant 0 : i32
    return %c0_i32, %c0_i32_0 : i32, i32
  }
  func.func @transform_1(%arg0: i32) -> (i32, i32) {
    %c0_i32 = arith.constant 0 : i32
    %c0_i32_0 = arith.constant 0 : i32
    %c0_i32_1 = arith.constant 0 : i32
    return %c0_i32, %c0_i32_0 : i32, i32
  }
  func.func @transform_2(%arg0: i32) -> (i32, i32) {
    %c0_i32 = arith.constant 0 : i32
    %c0_i32_0 = arith.constant 0 : i32
    %c0_i32_1 = arith.constant 0 : i32
    return %c0_i32, %c0_i32_0 : i32, i32
  }
  func.func @transform_3(%arg0: i32) -> (i32, i32) {
    %c0_i32 = arith.constant 0 : i32
    %c0_i32_0 = arith.constant 0 : i32
    %c0_i32_1 = arith.constant 0 : i32
    return %c0_i32, %c0_i32_0 : i32, i32
  }
  func.func @transform_4(%arg0: i32) -> (i32, i32) {
    %c0_i32 = arith.constant 0 : i32
    %c0_i32_0 = arith.constant 0 : i32
    %c0_i32_1 = arith.constant 0 : i32
    return %c0_i32, %c0_i32_0 : i32, i32
  }
}

</mosaic_0001>

<bundles_post_ra>
// kernel: tpu_custom_call.1
= control target key start
LH: loop header
LB: loop body
LE: loop exit
PB: predicated region body
PF: predicated region fallthrough
CT: control target
= control target key end

     0   :  { %s429_s0 = inlined_call_operand.vmem [shape: f32[64,32], index: 0, kind: input, shape index: {}]   ;;  %s430_s1 = inlined_call_operand.vmem [shape: f32[64,64], index: 1, kind: input, shape index: {}]   ;;  %s431_s2 = inlined_call_operand.vmem [shape: f32[32,128], index: 2, kind: input, shape index: {}]   ;;  %s432_s3 = inlined_call_operand.vmem [shape: f32[1,128], index: 3, kind: input, shape index: {}]   ;;  %s433_s4 = inlined_call_operand.hbm [shape: f32[64,128], index: 4, kind: output, shape index: {}]  }
   0x1   :  { %v29_v0 = vld [vmem:[%s431_s2 + $0x18] sm:$0xff]  ;;  %v28_v1 = vld [vmem:[%s431_s2 + $0x10] sm:$0xff]  ;;  %v27_v2 = vld [vmem:[%s431_s2 + $0x8] sm:$0xff] }
   0x2   :  { %67 = vmatpush.msra.mxu0 %v29_v0 }
   0x4   :  { %68 = vmatpush.msra.mxu0 %v28_v1 }
   0x5   :  { %9 = vsyncpa [#allocation3], 0  ;;  %v26_v3 = vld [vmem:[%s431_s2] sm:$0xff]  ;;  %vm30_vm0 = vcmask 261120   ;;  %v19_v5 = vld [vmem:[%s429_s0 + $0x8] sm:$0xff]  ;;  %vm104_vm1 = vcmask 523264  }
   0x6   :  { %69 = vmatpush.msra.mxu0 %v27_v2  ;;  %v18_v4 = vld [vmem:[%s429_s0] sm:$0xff]  ;;  %v20_v6 = vld [vmem:[%s429_s0 + $0x10] sm:$0xff]  ;;  %v21_v7 = vld [vmem:[%s429_s0 + $0x18] sm:$0xff]  ;;  %s229_s30 = sshll.u32 %s433_s4, 4  ;;  %s312_s5 = smov 128   ;;  %s230_s30 = int_to_ptr.hbm [resolvable:$true] %s229_s30 }
   0x7   :  { %v22_v8 = vld [vmem:[%s429_s0 + $0x20] sm:$0xff]  ;;  %v23_v9 = vld [vmem:[%s429_s0 + $0x28] sm:$0xff]  ;;  %v24_v10 = vld [vmem:[%s429_s0 + $0x30] sm:$0xff]  ;;  %s313_s6 = smov 8  }
   0x8   :  { %70 = vmatpush.msra.mxu0 %v26_v3  ;;  %v25_v11 = vld [vmem:[%s429_s0 + $0x38] sm:$0xff]  ;;  %v96_v20 = vld [vmem:[%s430_s1] sm:$0xff]  ;;  %v102_v21 = vld [vmem:[%s430_s1 + $0x30] sm:$0xff] }
   0x9   :  { %241 = vmatmul.msk.f32.vlgmr.msra.gmra.mxu0 %vm30_vm0, %v18_v4  ;;  %v97_v22 = vld [vmem:[%s430_s1 + $0x8] sm:$0xff]  ;;  %v103_v23 = vld [vmem:[%s430_s1 + $0x38] sm:$0xff]  ;;  %v98_v24 = vld [vmem:[%s430_s1 + $0x10] sm:$0xff] }
   0xa   :  { %v99_v25 = vld [vmem:[%s430_s1 + $0x18] sm:$0xff]  ;;  %v100_v26 = vld [vmem:[%s430_s1 + $0x20] sm:$0xff]  ;;  %v101_v27 = vld [vmem:[%s430_s1 + $0x28] sm:$0xff] }
   0xb   :  { %v284_v36 = vld [vmem:[%s432_s3] ss:$0 sm:$0xff]  ;;  %s311_s3 = smov [#allocation2]  }
   0xc   :  { %s227_s28 = sshll.u32 %s311_s3, 4  ;;  %s228_s28 = int_to_ptr.vmem [resolvable:$true] %s227_s28 }
  0x11   :  { %242 = vmatmul.msk.f32.gmra.mxu0 %vm30_vm0, %v19_v5 }
  0x19   :  { %243 = vmatmul.msk.f32.gmra.mxu0 %vm30_vm0, %v20_v6 }
  0x21   :  { %244 = vmatmul.msk.f32.gmra.mxu0 %vm30_vm0, %v21_v7 }
  0x29   :  { %245 = vmatmul.msk.f32.gmra.mxu0 %vm30_vm0, %v22_v8 }
  0x31   :  { %246 = vmatmul.msk.f32.gmra.mxu0 %vm30_vm0, %v23_v9 }
  0x39   :  { %247 = vmatmul.msk.f32.gmra.mxu0 %vm30_vm0, %v24_v10 }
  0x41   :  { %248 = vmatmul.msk.f32.gmra.mxu0 %vm30_vm0, %v25_v11 }
  0x86   :  { %v72_v12 = vpop.f32.mrf.mxu0 }
  0x8e   :  { %v75_v13 = vpop.f32.mrf.mxu0 }
  0x96   :  { %v78_v14 = vpop.f32.mrf.mxu0 }
  0x9e   :  { %v81_v15 = vpop.f32.mrf.mxu0 }
  0xa6   :  { %v84_v16 = vpop.f32.mrf.mxu0 }
  0xae   :  { %v87_v17 = vpop.f32.mrf.mxu0 }
  0xb6   :  { %v90_v18 = vpop.f32.mrf.mxu0 }
  0xbe   :  { %v93_v19 = vpop.f32.mrf.mxu0 }
  0xbf   :  { %137 = vmatpush.msra.mxu1 %v93_v19  ;;  %265 = vmatpush.msra.mxu3 %v93_v19 }
  0xc1   :  { %138 = vmatpush.msra.mxu1 %v90_v18  ;;  %266 = vmatpush.msra.mxu3 %v90_v18 }
  0xc3   :  { %139 = vmatpush.msra.mxu1 %v87_v17  ;;  %267 = vmatpush.msra.mxu3 %v87_v17 }
  0xc5   :  { %140 = vmatpush.msra.mxu1 %v84_v16  ;;  %268 = vmatpush.msra.mxu3 %v84_v16 }
  0xc7   :  { %141 = vmatpush.msra.mxu1 %v81_v15  ;;  %269 = vmatpush.msra.mxu3 %v81_v15 }
  0xc9   :  { %142 = vmatpush.msra.mxu1 %v78_v14  ;;  %270 = vmatpush.msra.mxu3 %v78_v14 }
  0xcb   :  { %143 = vmatpush.msra.mxu1 %v75_v13  ;;  %271 = vmatpush.msra.mxu3 %v75_v13 }
  0xcd   :  { %144 = vmatpush.msra.mxu1 %v72_v12  ;;  %272 = vmatpush.msra.mxu3 %v72_v12 }
  0xce   :  { %249 = vmatmul.msk.f32.vlgmr.msra.gmra.mxu1 %vm104_vm1, %v96_v20  ;;  %255 = vmatmul.msk.f32.vlgmr.msra.gmra.mxu3 %vm104_vm1, %v102_v21 }
  0xd6   :  { %250 = vmatmul.msk.f32.gmra.mxu1 %vm104_vm1, %v97_v22  ;;  %256 = vmatmul.msk.f32.gmra.mxu3 %vm104_vm1, %v103_v23 }
  0xde   :  { %251 = vmatmul.msk.f32.gmra.mxu1 %vm104_vm1, %v98_v24 }
  0xe6   :  { %252 = vmatmul.msk.f32.gmra.mxu1 %vm104_vm1, %v99_v25 }
  0xee   :  { %253 = vmatmul.msk.f32.gmra.mxu1 %vm104_vm1, %v100_v26 }
  0xf6   :  { %254 = vmatmul.msk.f32.gmra.mxu1 %vm104_vm1, %v101_v27 }
 0x14b   :  { %v146_v28 = vpop.f32.mrf.mxu1 }
 0x151   :  { %v164_v29 = vpop.f32.mrf.mxu3 }
 0x153   :  { %v149_v30 = vpop.f32.mrf.mxu1 }
 0x159   :  { %v167_v31 = vpop.f32.mrf.mxu3 }
 0x15a   :  { %182 = vmatpush.msra.mxu2 %v167_v31  ;;  %273 = vmatpush.msrb.mxu3 %v167_v31 }
 0x15b   :  { %v152_v32 = vpop.f32.mrf.mxu1 }
 0x15c   :  { %183 = vmatpush.msra.mxu2 %v164_v29  ;;  %274 = vmatpush.msrb.mxu3 %v164_v29 }
 0x163   :  { %v155_v33 = vpop.f32.mrf.mxu1 }
 0x16b   :  { %v158_v34 = vpop.f32.mrf.mxu1 }
 0x173   :  { %v161_v35 = vpop.f32.mrf.mxu1 }
 0x174   :  { %184 = vmatpush.msra.mxu2 %v161_v35  ;;  %275 = vmatpush.msrb.mxu3 %v161_v35 }
 0x176   :  { %185 = vmatpush.msra.mxu2 %v158_v34  ;;  %276 = vmatpush.msrb.mxu3 %v158_v34 }
 0x178   :  { %186 = vmatpush.msra.mxu2 %v155_v33  ;;  %277 = vmatpush.msrb.mxu3 %v155_v33 }
 0x17a   :  { %187 = vmatpush.msra.mxu2 %v152_v32  ;;  %278 = vmatpush.msrb.mxu3 %v152_v32 }
 0x17c   :  { %188 = vmatpush.msra.mxu2 %v149_v30  ;;  %279 = vmatpush.msrb.mxu3 %v149_v30 }
 0x17e   :  { %189 = vmatpush.msra.mxu2 %v146_v28  ;;  %280 = vmatpush.msrb.mxu3 %v146_v28 }
 0x17f   :  { %257 = vmatmul.msk.f32.vlgmr.msra.gmra.mxu2 %vm104_vm1, %v96_v20  ;;  %263 = vmatmul.msk.f32.vlgmr.msrb.gmra.mxu3 %vm104_vm1, %v102_v21 }
 0x187   :  { %258 = vmatmul.msk.f32.gmra.mxu2 %vm104_vm1, %v97_v22  ;;  %264 = vmatmul.msk.f32.gmra.mxu3 %vm104_vm1, %v103_v23 }
 0x18f   :  { %259 = vmatmul.msk.f32.gmra.mxu2 %vm104_vm1, %v98_v24 }
 0x197   :  { %260 = vmatmul.msk.f32.gmra.mxu2 %vm104_vm1, %v99_v25 }
 0x19f   :  { %261 = vmatmul.msk.f32.gmra.mxu2 %vm104_vm1, %v100_v26 }
 0x1a7   :  { %262 = vmatmul.msk.f32.gmra.mxu2 %vm104_vm1, %v101_v27 }
 0x202   :  { %v191_v37 = vpop.f32.mrf.mxu2  ;;  %v209_v38 = vpop.f32.mrf.mxu3 }
 0x203   :  { %v192_v39 = vadd.f32 %v284_v36, %v191_v37  ;;  %v210_v40 = vadd.f32 %v284_v36, %v209_v38 }
 0x205   :  { %215 = vst [vmem:[#allocation2] sm:$0xff] %v192_v39 }
 0x206   :  { %221 = vst [vmem:[#allocation2 + $0x30] sm:$0xff] %v210_v40 }
 0x20a   :  { %v194_v41 = vpop.f32.mrf.mxu2  ;;  %v212_v42 = vpop.f32.mrf.mxu3 }
 0x20b   :  { %v195_v43 = vadd.f32 %v284_v36, %v194_v41  ;;  %v213_v44 = vadd.f32 %v284_v36, %v212_v42 }
 0x20d   :  { %216 = vst [vmem:[#allocation2 + $0x8] sm:$0xff] %v195_v43 }
 0x20e   :  { %222 = vst [vmem:[#allocation2 + $0x38] sm:$0xff] %v213_v44 }
 0x212   :  { %v197_v45 = vpop.f32.mrf.mxu2 }
 0x213   :  { %v198_v46 = vadd.f32 %v284_v36, %v197_v45 }
 0x215   :  { %217 = vst [vmem:[#allocation2 + $0x10] sm:$0xff] %v198_v46 }
 0x21a   :  { %v200_v47 = vpop.f32.mrf.mxu2 }
 0x21b   :  { %v201_v48 = vadd.f32 %v284_v36, %v200_v47 }
 0x21d   :  { %218 = vst [vmem:[#allocation2 + $0x18] sm:$0xff] %v201_v48 }
 0x222   :  { %v203_v49 = vpop.f32.mrf.mxu2 }
 0x223   :  { %v204_v50 = vadd.f32 %v284_v36, %v203_v49 }
 0x225   :  { %219 = vst [vmem:[#allocation2 + $0x20] sm:$0xff] %v204_v50 }
 0x22a   :  { %v206_v51 = vpop.f32.mrf.mxu2 }
 0x22b   :  { %v207_v52 = vadd.f32 %v284_v36, %v206_v51 }
 0x22d   :  { %220 = vst [vmem:[#allocation2 + $0x28] sm:$0xff] %v207_v52 }
 0x22e   :  { %235 = dma.vmem_to_hbm [thread:$0]  %s228_s28, 1024, %s230_s30, [#allocation3], %s312_s5, %s312_s5, %s313_s6  }
 0x22f   :  { %309 = dma.done.wait [#allocation3], 1024  }
 0x230   :  { %310 = vsyncadd [#allocation3], 4294966272 }
 0x231   :  { %240 = vsyncpa [#allocation3], 1 }

</bundles_post_ra>
